<compile_context>
chip_gen: v5e
topology: v5e:2x2
jax: 0.10.0
libtpu: 0.0.40
codegen_flags: <defaults>
</compile_context>

<pallas_src>
import functools

import jax
import jax.numpy as jnp
from jax.experimental import pallas as pl
from jax.experimental.pallas import tpu as pltpu


def _round_up(n, m):
    return ((n + m - 1) // m) * m


def _aft_simple_kernel(x_ref, wqkv_ref, wp_ref, bqkv_ref, bp_ref, o_ref,
                       q_scr, m_scr, l_scr, n_scr, *, block_t):
    bb, T, dim = x_ref.shape
    hp = wp_ref.shape[0]          # lane-padded hidden dim (multiple of 128)
    tt = block_t
    nt = T // tt

    # Re-init running accumulators every grid step (scratch persists across steps).
    m_scr[...] = jnp.full(m_scr.shape, -jnp.inf, m_scr.dtype)
    l_scr[...] = jnp.zeros(l_scr.shape, l_scr.dtype)
    n_scr[...] = jnp.zeros(n_scr.shape, n_scr.dtype)

    def pass1(t0):
        # Fused Q/K/V projection for this T tile: one wide MXU matmul, f32 acc.
        x2d = x_ref[:, pl.ds(t0, tt), :].reshape(bb * tt, dim)
        qkv = jnp.dot(x2d, wqkv_ref[...], preferred_element_type=jnp.float32)
        qkv = qkv + bqkv_ref[...]                                   # bias in f32
        # hp % 128 == 0 -> these column slices are lane-aligned free views.
        q_scr[:, pl.ds(t0, tt), :] = qkv[:, 0 * hp:1 * hp].reshape(bb, tt, hp)
        k = qkv[:, 1 * hp:2 * hp].reshape(bb, tt, hp)
        v = qkv[:, 2 * hp:3 * hp].reshape(bb, tt, hp)
        # Online (flash-style) softmax-over-T fused with the weighted V sum:
        # never materializes softmax(K) or exp(K)*V at full T.
        m_prev = m_scr[...]
        m_new = jnp.maximum(m_prev, jnp.max(k, axis=1, keepdims=True))
        scale = jnp.exp(m_prev - m_new)
        e = jnp.exp(k - m_new)
        l_scr[...] = scale * l_scr[...] + jnp.sum(e, axis=1, keepdims=True)
        n_scr[...] = scale * n_scr[...] + jnp.sum(e * v, axis=1, keepdims=True)
        m_scr[...] = m_new

    if nt == 1:
        pass1(0)
    else:
        @pl.loop(0, nt)
        def _(i):
            pass1(pl.multiple_of(i * tt, tt))

    # weights = sum_t softmax(K)_t * V_t  -> (bb, 1, hp), f32.
    weights = n_scr[...] * pl.reciprocal(l_scr[...], approx=False)

    def pass2(t0):
        q = q_scr[:, pl.ds(t0, tt), :]
        yt = (jax.nn.sigmoid(q) * weights).reshape(bb * tt, hp)     # f32 elementwise
        out = jnp.dot(yt.astype(wp_ref.dtype), wp_ref[...],
                      preferred_element_type=jnp.float32)
        out = out + bp_ref[...]
        o_ref[:, pl.ds(t0, tt), :] = out.reshape(bb, tt, dim).astype(o_ref.dtype)

    if nt == 1:
        pass2(0)
    else:
        @pl.loop(0, nt)
        def _(i):
            pass2(pl.multiple_of(i * tt, tt))


def _vmem_budget_bytes():
    phys = 128 << 20
    try:
        info = pltpu.get_tpu_info()
        cap = getattr(info, "vmem_capacity_bytes", None)
        if cap:
            phys = int(cap)
    except Exception:
        pass
    # Leave headroom: ~96 MiB on v5e/v6e (128 MiB physical), ~48 MiB on v7x (64 MiB).
    return (phys * 3) // 4


def _estimate_vmem(bb, T, tt, dim, hp, in_bytes, out_bytes):
    weights = 4 * hp * dim * in_bytes + (3 * hp + dim) * 4    # single-buffered W + b
    io = 2 * bb * T * dim * (in_bytes + out_bytes)            # double-buffered x / out
    scr = bb * T * hp * 4 + 3 * bb * 8 * hp * 4               # Q staging + m/l/n
    tmp = 8 * bb * tt * hp * 4                                # per-tile live temporaries
    return weights + io + scr + tmp


def _pick_block_t(T, min_align, cap=256):
    if T <= cap:
        return T
    for tt in range(cap, min_align - 1, -1):
        if T % tt == 0 and tt % min_align == 0:
            return tt
    return T


def _choose_block_batch(B, T, tt, dim, hp, in_bytes, out_bytes, budget,
                        target_rows=1024):
    divisors = [d for d in range(1, B + 1) if B % d == 0]
    best = 1
    for bb in divisors:
        if _estimate_vmem(bb, T, tt, dim, hp, in_bytes, out_bytes) > budget:
            break
        best = bb
        if bb * T >= target_rows:
            break
    if best == B and B > 1:
        # Keep >= 2 grid steps so v7x's second TensorCore gets a share of the
        # 'parallel' batch axis (on v5e/v6e this costs one ~0.35us step).
        best = [d for d in divisors if d < B][-1]
    return best


def aft_simple(x, wq, bq, wk, bk, wv, bv, wp, bp, *,
               block_batch=None, block_t=None, use_bf16=False):
    """AFTSimple forward. x: (B,T,dim); W* stored (in,out); biases (1,n)."""
    B, T, dim = x.shape
    hidden = wq.shape[1]
    hp = _round_up(hidden, 128)   # lane-align the hidden slices of the fused QKV

    in_dtype = jnp.bfloat16 if use_bf16 else x.dtype
    in_bytes = jnp.dtype(in_dtype).itemsize
    out_bytes = jnp.dtype(x.dtype).itemsize

    def pad_w(w):   # (dim, hidden) -> (dim, hp), exact (zeros contribute zero)
        return jnp.pad(w, ((0, 0), (0, hp - hidden))) if hp != hidden else w

    def pad_b(b):   # (1, hidden) -> (1, hp)
        return jnp.pad(b, ((0, 0), (0, hp - hidden))) if hp != hidden else b

    # Fused, lane-aligned QKV weights; matmul inputs optionally bf16 (f32 acc in
    # kernel).  Biases and all elementwise math stay f32.
    wqkv = jnp.concatenate([pad_w(wq), pad_w(wk), pad_w(wv)], axis=1).astype(in_dtype)
    bqkv = jnp.concatenate([pad_b(bq), pad_b(bk), pad_b(bv)], axis=1).astype(jnp.float32)
    wp_p = (jnp.pad(wp, ((0, hp - hidden), (0, 0))) if hp != hidden else wp).astype(in_dtype)
    bp_f = bp.astype(jnp.float32)
    x_in = x.astype(in_dtype)

    min_align = 16 if in_bytes == 2 else 8
    tt = block_t if block_t is not None else _pick_block_t(T, min_align)
    assert T % tt == 0, f"block_t {tt} must divide T {T}"
    if tt != T:
        assert tt % min_align == 0, f"block_t {tt} must be a multiple of {min_align}"

    budget = int(_vmem_budget_bytes())
    bb = (block_batch if block_batch is not None
          else _choose_block_batch(B, T, tt, dim, hp, in_bytes, out_bytes, budget))
    assert B % bb == 0, f"block_batch {bb} must divide batch {B}"
    grid = (B // bb,)

    kernel = functools.partial(_aft_simple_kernel, block_t=tt)

    # Output is written un-padded as (bb, T, dim): masked store when dim % 128 != 0,
    # which is cheaper than padding dim and re-slicing in the wrapper.
    return pl.pallas_call(
        kernel,
        out_shape=jax.ShapeDtypeStruct((B, T, dim), x.dtype),
        grid_spec=pltpu.PrefetchScalarGridSpec(
            num_scalar_prefetch=0,
            grid=grid,
            in_specs=[
                # TODO(synk): if the x DMA becomes exposed after T-tiling at
                # production sizes, bump this to pipeline_mode=pl.Buffered(3).
                pl.BlockSpec((bb, T, dim), lambda b: (b, 0, 0)),
                # Constant-index weight/bias blocks: single-buffered so the
                # pipeline does not allocate a never-used second copy.
                pl.BlockSpec((dim, 3 * hp), lambda b: (0, 0),
                             pipeline_mode=pl.Buffered(1)),
                pl.BlockSpec((hp, dim), lambda b: (0, 0),
                             pipeline_mode=pl.Buffered(1)),
                pl.BlockSpec((1, 3 * hp), lambda b: (0, 0),
                             pipeline_mode=pl.Buffered(1)),
                pl.BlockSpec((1, dim), lambda b: (0, 0),
                             pipeline_mode=pl.Buffered(1)),
            ],
            out_specs=pl.BlockSpec((bb, T, dim), lambda b: (b, 0, 0)),
            scratch_shapes=[
                pltpu.VMEM((bb, T, hp), jnp.float32),   # Q staging for pass 2
                pltpu.VMEM((bb, 1, hp), jnp.float32),   # running max   (m)
                pltpu.VMEM((bb, 1, hp), jnp.float32),   # running denom (l)
                pltpu.VMEM((bb, 1, hp), jnp.float32),   # running num   (n)
            ],
        ),
        compiler_params=pltpu.CompilerParams(
            dimension_semantics=("parallel",),
            vmem_limit_bytes=budget,
        ),
    )(x_in, wqkv, wp_p, bqkv, bp_f)


def aft_simple_reference(x, wq, bq, wk, bk, wv, bv, wp, bp):
    """Pure-JAX reference mirroring the PyTorch forward."""
    Q = x @ wq + bq
    K = x @ wk + bk
    V = x @ wv + bv
    weights = jnp.sum(jax.nn.softmax(K, axis=1) * V, axis=1, keepdims=True)
    Yt = jax.nn.sigmoid(Q) * weights
    return Yt @ wp + bp


if __name__ == "__main__":
    key = jax.random.PRNGKey(0)
    kx, kx2, kq, kk, kv, kp, kbq, kbk, kbv, kbp = jax.random.split(key, 10)

    B, T, dim, hidden = 2, 8, 32, 64
    scale_in = 1.0 / (dim ** 0.5)
    scale_h = 1.0 / (hidden ** 0.5)

    x = jax.random.normal(kx, (B, T, dim), dtype=jnp.float32)
    wq = jax.random.uniform(kq, (dim, hidden), jnp.float32, -scale_in, scale_in)
    wk = jax.random.uniform(kk, (dim, hidden), jnp.float32, -scale_in, scale_in)
    wv = jax.random.uniform(kv, (dim, hidden), jnp.float32, -scale_in, scale_in)
    wp = jax.random.uniform(kp, (hidden, dim), jnp.float32, -scale_h, scale_h)
    bq = jax.random.uniform(kbq, (1, hidden), jnp.float32, -scale_in, scale_in)
    bk = jax.random.uniform(kbk, (1, hidden), jnp.float32, -scale_in, scale_in)
    bv = jax.random.uniform(kbv, (1, hidden), jnp.float32, -scale_in, scale_in)
    bp = jax.random.uniform(kbp, (1, dim), jnp.float32, -scale_h, scale_h)

    params = (wq, bq, wk, bk, wv, bv, wp, bp)

    # 1) Exact f32 path (single T tile per grid step).
    out = jax.block_until_ready(aft_simple(x, *params))
    ref = aft_simple_reference(x, *params)
    assert out.shape == (B, T, dim)
    assert jnp.allclose(out, ref, atol=1e-5, rtol=1e-5), (
        f"f32 max abs err: {jnp.max(jnp.abs(out - ref))}")

    # 2) f32 path exercising the in-kernel T tiling (4 tiles of 8).
    T2 = 32
    x2 = jax.random.normal(kx2, (B, T2, dim), dtype=jnp.float32)
    out2 = jax.block_until_ready(aft_simple(x2, *params, block_t=8))
    ref2 = aft_simple_reference(x2, *params)
    assert jnp.allclose(out2, ref2, atol=1e-5, rtol=1e-5), (
        f"tiled f32 max abs err: {jnp.max(jnp.abs(out2 - ref2))}")

    # 3) bf16 MXU path (f32 accumulation, f32 elementwise math) — looser tolerance.
    out_bf = jax.block_until_ready(aft_simple(x, *params, use_bf16=True))
    assert jnp.allclose(out_bf, ref, atol=5e-2, rtol=5e-2), (
        f"bf16 max abs err: {jnp.max(jnp.abs(out_bf - ref))}")

    print("KERNEL_OK")
</pallas_src>

<mosaic_0001>
module attributes {stable_mosaic.version = 11 : i64} {
  func.func @_aft_simple_kernel(%arg0: i32, %arg1: memref<1x8x32xf32, #tpu.memory_space<vmem>>, %arg2: memref<32x384xf32, #tpu.memory_space<vmem>>, %arg3: memref<128x32xf32, #tpu.memory_space<vmem>>, %arg4: memref<1x384xf32, #tpu.memory_space<vmem>>, %arg5: memref<1x32xf32, #tpu.memory_space<vmem>>, %arg6: memref<1x8x32xf32, #tpu.memory_space<vmem>>, %arg7: memref<1x8x128xf32, #tpu.memory_space<vmem>>, %arg8: memref<1x1x128xf32, #tpu.memory_space<vmem>>, %arg9: memref<1x1x128xf32, #tpu.memory_space<vmem>>, %arg10: memref<1x1x128xf32, #tpu.memory_space<vmem>>) attributes {dimension_semantics = [#tpu.dimension_semantics<parallel>], iteration_bounds = array<i64: 2>, scalar_prefetch = 0 : i64, scratch_operands = 4 : i64, tpu.core_type = #tpu.core_type<tc>, window_params = [{transform_indices = @transform_0, window_bounds = array<i64: 1, 8, 32>}, {pipeline_mode = #tpu.pipeline_mode<synchronous>, transform_indices = @transform_1, window_bounds = array<i64: 32, 384>}, {pipeline_mode = #tpu.pipeline_mode<synchronous>, transform_indices = @transform_2, window_bounds = array<i64: 128, 32>}, {pipeline_mode = #tpu.pipeline_mode<synchronous>, transform_indices = @transform_3, window_bounds = array<i64: 1, 384>}, {pipeline_mode = #tpu.pipeline_mode<synchronous>, transform_indices = @transform_4, window_bounds = array<i64: 1, 32>}, {transform_indices = @transform_5, window_bounds = array<i64: 1, 8, 32>}]} {
    %cst = arith.constant 0xFF800000 : f32
    %0 = vector.broadcast %cst : f32 to vector<1x1x128xf32>
    %c0 = arith.constant 0 : index
    %c0_0 = arith.constant 0 : index
    %c0_1 = arith.constant 0 : index
    %1 = vector.load %arg8[%c0, %c0_0, %c0_1] : memref<1x1x128xf32, #tpu.memory_space<vmem>>, vector<1x1x128xf32>
    tpu.vector_store %arg8[%c0, %c0_0, %c0_1], %0 {strides = array<i32>} : memref<1x1x128xf32, #tpu.memory_space<vmem>>, vector<1x1x128xf32>,
    %cst_2 = arith.constant 0.000000e+00 : f32
    %2 = vector.broadcast %cst_2 : f32 to vector<1x1x128xf32>
    %c0_3 = arith.constant 0 : index
    %c0_4 = arith.constant 0 : index
    %c0_5 = arith.constant 0 : index
    %3 = vector.load %arg9[%c0_3, %c0_4, %c0_5] : memref<1x1x128xf32, #tpu.memory_space<vmem>>, vector<1x1x128xf32>
    tpu.vector_store %arg9[%c0_3, %c0_4, %c0_5], %2 {strides = array<i32>} : memref<1x1x128xf32, #tpu.memory_space<vmem>>, vector<1x1x128xf32>,
    %cst_6 = arith.constant 0.000000e+00 : f32
    %4 = vector.broadcast %cst_6 : f32 to vector<1x1x128xf32>
    %c0_7 = arith.constant 0 : index
    %c0_8 = arith.constant 0 : index
    %c0_9 = arith.constant 0 : index
    %5 = vector.load %arg10[%c0_7, %c0_8, %c0_9] : memref<1x1x128xf32, #tpu.memory_space<vmem>>, vector<1x1x128xf32>
    tpu.vector_store %arg10[%c0_7, %c0_8, %c0_9], %4 {strides = array<i32>} : memref<1x1x128xf32, #tpu.memory_space<vmem>>, vector<1x1x128xf32>,
    %c0_10 = arith.constant 0 : index
    %c0_11 = arith.constant 0 : index
    %c0_12 = arith.constant 0 : index
    %6 = vector.load %arg1[%c0_10, %c0_11, %c0_12] : memref<1x8x32xf32, #tpu.memory_space<vmem>>, vector<1x8x32xf32>
    %7 = vector.shape_cast %6 : vector<1x8x32xf32> to vector<8x32xf32>
    %c0_13 = arith.constant 0 : index
    %c0_14 = arith.constant 0 : index
    %8 = vector.load %arg2[%c0_13, %c0_14] : memref<32x384xf32, #tpu.memory_space<vmem>>, vector<32x384xf32>
    %cst_15 = arith.constant dense<0.000000e+00> : vector<8x384xf32>
    %9 = tpu.matmul %7, %8, %cst_15 {dimension_numbers = #tpu.dot_dimension_numbers<[1], [0], [0], [1], [0, 0, 1, 1], [], []>} : vector<8x32xf32>, vector<32x384xf32>, vector<8x384xf32> -> vector<8x384xf32>
    %c0_16 = arith.constant 0 : index
    %c0_17 = arith.constant 0 : index
    %10 = vector.load %arg4[%c0_16, %c0_17] : memref<1x384xf32, #tpu.memory_space<vmem>>, vector<1x384xf32>
    %11 = vector.broadcast %10 : vector<1x384xf32> to vector<8x384xf32>
    %12 = arith.addf %9, %11 : vector<8x384xf32>
    %13 = vector.extract_strided_slice %12 {offsets = [0, 0], sizes = [8, 128], strides = [1, 1]} : vector<8x384xf32> to vector<8x128xf32>
    %14 = vector.shape_cast %13 : vector<8x128xf32> to vector<1x8x128xf32>
    %c0_18 = arith.constant 0 : index
    %c0_19 = arith.constant 0 : index
    %c0_20 = arith.constant 0 : index
    %15 = vector.load %arg7[%c0_18, %c0_19, %c0_20] : memref<1x8x128xf32, #tpu.memory_space<vmem>>, vector<1x8x128xf32>
    tpu.vector_store %arg7[%c0_18, %c0_19, %c0_20], %14 {strides = array<i32>} : memref<1x8x128xf32, #tpu.memory_space<vmem>>, vector<1x8x128xf32>,
    %16 = vector.extract_strided_slice %12 {offsets = [0, 128], sizes = [8, 128], strides = [1, 1]} : vector<8x384xf32> to vector<8x128xf32>
    %17 = vector.shape_cast %16 : vector<8x128xf32> to vector<1x8x128xf32>
    %18 = vector.extract_strided_slice %12 {offsets = [0, 256], sizes = [8, 128], strides = [1, 1]} : vector<8x384xf32> to vector<8x128xf32>
    %19 = vector.shape_cast %18 : vector<8x128xf32> to vector<1x8x128xf32>
    %c0_21 = arith.constant 0 : index
    %c0_22 = arith.constant 0 : index
    %c0_23 = arith.constant 0 : index
    %20 = vector.load %arg8[%c0_21, %c0_22, %c0_23] : memref<1x1x128xf32, #tpu.memory_space<vmem>>, vector<1x1x128xf32>
    %cst_24 = arith.constant dense<0xFF800000> : vector<1x128xf32>
    %21 = vector.multi_reduction <maximumf>, %17, %cst_24 [1] : vector<1x8x128xf32> to vector<1x128xf32>
    %22 = vector.shape_cast %21 : vector<1x128xf32> to vector<1x1x128xf32>
    %23 = arith.maximumf %20, %22 : vector<1x1x128xf32>
    %24 = arith.subf %20, %23 : vector<1x1x128xf32>
    %25 = math.exp %24 : vector<1x1x128xf32>
    %26 = vector.broadcast %23 : vector<1x1x128xf32> to vector<1x8x128xf32>
    %27 = arith.subf %17, %26 : vector<1x8x128xf32>
    %28 = math.exp %27 : vector<1x8x128xf32>
    %c0_25 = arith.constant 0 : index
    %c0_26 = arith.constant 0 : index
    %c0_27 = arith.constant 0 : index
    %29 = vector.load %arg9[%c0_25, %c0_26, %c0_27] : memref<1x1x128xf32, #tpu.memory_space<vmem>>, vector<1x1x128xf32>
    %30 = arith.mulf %25, %29 : vector<1x1x128xf32>
    %cst_28 = arith.constant dense<0.000000e+00> : vector<1x128xf32>
    %31 = vector.multi_reduction <add>, %28, %cst_28 [1] : vector<1x8x128xf32> to vector<1x128xf32>
    %32 = vector.shape_cast %31 : vector<1x128xf32> to vector<1x1x128xf32>
    %33 = arith.addf %30, %32 : vector<1x1x128xf32>
    %c0_29 = arith.constant 0 : index
    %c0_30 = arith.constant 0 : index
    %c0_31 = arith.constant 0 : index
    %34 = vector.load %arg9[%c0_29, %c0_30, %c0_31] : memref<1x1x128xf32, #tpu.memory_space<vmem>>, vector<1x1x128xf32>
    tpu.vector_store %arg9[%c0_29, %c0_30, %c0_31], %33 {strides = array<i32>} : memref<1x1x128xf32, #tpu.memory_space<vmem>>, vector<1x1x128xf32>,
    %c0_32 = arith.constant 0 : index
    %c0_33 = arith.constant 0 : index
    %c0_34 = arith.constant 0 : index
    %35 = vector.load %arg10[%c0_32, %c0_33, %c0_34] : memref<1x1x128xf32, #tpu.memory_space<vmem>>, vector<1x1x128xf32>
    %36 = arith.mulf %25, %35 : vector<1x1x128xf32>
    %37 = arith.mulf %28, %19 : vector<1x8x128xf32>
    %cst_35 = arith.constant dense<0.000000e+00> : vector<1x128xf32>
    %38 = vector.multi_reduction <add>, %37, %cst_35 [1] : vector<1x8x128xf32> to vector<1x128xf32>
    %39 = vector.shape_cast %38 : vector<1x128xf32> to vector<1x1x128xf32>
    %40 = arith.addf %36, %39 : vector<1x1x128xf32>
    %c0_36 = arith.constant 0 : index
    %c0_37 = arith.constant 0 : index
    %c0_38 = arith.constant 0 : index
    %41 = vector.load %arg10[%c0_36, %c0_37, %c0_38] : memref<1x1x128xf32, #tpu.memory_space<vmem>>, vector<1x1x128xf32>
    tpu.vector_store %arg10[%c0_36, %c0_37, %c0_38], %40 {strides = array<i32>} : memref<1x1x128xf32, #tpu.memory_space<vmem>>, vector<1x1x128xf32>,
    %c0_39 = arith.constant 0 : index
    %c0_40 = arith.constant 0 : index
    %c0_41 = arith.constant 0 : index
    %42 = vector.load %arg8[%c0_39, %c0_40, %c0_41] : memref<1x1x128xf32, #tpu.memory_space<vmem>>, vector<1x1x128xf32>
    tpu.vector_store %arg8[%c0_39, %c0_40, %c0_41], %23 {strides = array<i32>} : memref<1x1x128xf32, #tpu.memory_space<vmem>>, vector<1x1x128xf32>,
    %c0_42 = arith.constant 0 : index
    %c0_43 = arith.constant 0 : index
    %c0_44 = arith.constant 0 : index
    %43 = vector.load %arg10[%c0_42, %c0_43, %c0_44] : memref<1x1x128xf32, #tpu.memory_space<vmem>>, vector<1x1x128xf32>
    %c0_45 = arith.constant 0 : index
    %c0_46 = arith.constant 0 : index
    %c0_47 = arith.constant 0 : index
    %44 = vector.load %arg9[%c0_45, %c0_46, %c0_47] : memref<1x1x128xf32, #tpu.memory_space<vmem>>, vector<1x1x128xf32>
    %45 = tpu.reciprocal %44 : vector<1x1x128xf32> -> vector<1x1x128xf32>
    %46 = arith.mulf %43, %45 : vector<1x1x128xf32>
    %c0_48 = arith.constant 0 : index
    %c0_49 = arith.constant 0 : index
    %c0_50 = arith.constant 0 : index
    %47 = vector.load %arg7[%c0_48, %c0_49, %c0_50] : memref<1x8x128xf32, #tpu.memory_space<vmem>>, vector<1x8x128xf32>
    %48 = arith.negf %47 : vector<1x8x128xf32>
    %49 = math.exp %48 : vector<1x8x128xf32>
    %cst_51 = arith.constant 1.000000e+00 : f32
    %50 = vector.broadcast %cst_51 : f32 to vector<1x8x128xf32>
    %51 = arith.addf %50, %49 : vector<1x8x128xf32>
    %52 = arith.divf %50, %51 : vector<1x8x128xf32>
    %53 = vector.broadcast %46 : vector<1x1x128xf32> to vector<1x8x128xf32>
    %54 = arith.mulf %52, %53 : vector<1x8x128xf32>
    %55 = vector.shape_cast %54 : vector<1x8x128xf32> to vector<8x128xf32>
    %c0_52 = arith.constant 0 : index
    %c0_53 = arith.constant 0 : index
    %56 = vector.load %arg3[%c0_52, %c0_53] : memref<128x32xf32, #tpu.memory_space<vmem>>, vector<128x32xf32>
    %cst_54 = arith.constant dense<0.000000e+00> : vector<8x32xf32>
    %57 = tpu.matmul %55, %56, %cst_54 {dimension_numbers = #tpu.dot_dimension_numbers<[1], [0], [0], [1], [0, 0, 1, 1], [], []>} : vector<8x128xf32>, vector<128x32xf32>, vector<8x32xf32> -> vector<8x32xf32>
    %c0_55 = arith.constant 0 : index
    %c0_56 = arith.constant 0 : index
    %58 = vector.load %arg5[%c0_55, %c0_56] : memref<1x32xf32, #tpu.memory_space<vmem>>, vector<1x32xf32>
    %59 = vector.broadcast %58 : vector<1x32xf32> to vector<8x32xf32>
    %60 = arith.addf %57, %59 : vector<8x32xf32>
    %61 = vector.shape_cast %60 : vector<8x32xf32> to vector<1x8x32xf32>
    %c0_57 = arith.constant 0 : index
    %c0_58 = arith.constant 0 : index
    %c0_59 = arith.constant 0 : index
    %62 = vector.load %arg6[%c0_57, %c0_58, %c0_59] : memref<1x8x32xf32, #tpu.memory_space<vmem>>, vector<1x8x32xf32>
    tpu.vector_store %arg6[%c0_57, %c0_58, %c0_59], %61 {strides = array<i32>} : memref<1x8x32xf32, #tpu.memory_space<vmem>>, vector<1x8x32xf32>,
    return
  }
  func.func @transform_0(%arg0: i32) -> (i32, i32, i32) {
    %c0_i32 = arith.constant 0 : i32
    %c0_i32_0 = arith.constant 0 : i32
    %c0_i32_1 = arith.constant 0 : i32
    return %arg0, %c0_i32, %c0_i32_0 : i32, i32, i32
  }
  func.func @transform_1(%arg0: i32) -> (i32, i32) {
    %c0_i32 = arith.constant 0 : i32
    %c0_i32_0 = arith.constant 0 : i32
    %c0_i32_1 = arith.constant 0 : i32
    return %c0_i32, %c0_i32_0 : i32, i32
  }
  func.func @transform_2(%arg0: i32) -> (i32, i32) {
    %c0_i32 = arith.constant 0 : i32
    %c0_i32_0 = arith.constant 0 : i32
    %c0_i32_1 = arith.constant 0 : i32
    return %c0_i32, %c0_i32_0 : i32, i32
  }
  func.func @transform_3(%arg0: i32) -> (i32, i32) {
    %c0_i32 = arith.constant 0 : i32
    %c0_i32_0 = arith.constant 0 : i32
    %c0_i32_1 = arith.constant 0 : i32
    return %c0_i32, %c0_i32_0 : i32, i32
  }
  func.func @transform_4(%arg0: i32) -> (i32, i32) {
    %c0_i32 = arith.constant 0 : i32
    %c0_i32_0 = arith.constant 0 : i32
    %c0_i32_1 = arith.constant 0 : i32
    return %c0_i32, %c0_i32_0 : i32, i32
  }
  func.func @transform_5(%arg0: i32) -> (i32, i32, i32) {
    %c0_i32 = arith.constant 0 : i32
    %c0_i32_0 = arith.constant 0 : i32
    %c0_i32_1 = arith.constant 0 : i32
    return %arg0, %c0_i32, %c0_i32_0 : i32, i32, i32
  }
}

</mosaic_0001>

<bundles_post_ra>
// kernel: tpu_custom_call.1
= control target key start
LH: loop header
LB: loop body
LE: loop exit
PB: predicated region body
PF: predicated region fallthrough
CT: control target
= control target key end

     0   :  { %10 = vsyncpa [#allocation7], 0  ;;  %s846_s0 = inlined_call_operand.vmem [shape: f32[2,8,32], index: 0, kind: input, shape index: {}]   ;;  %s847_s1 = inlined_call_operand.vmem [shape: f32[32,384], index: 1, kind: input, shape index: {}]   ;;  %s848_s2 = inlined_call_operand.vmem [shape: f32[128,32], index: 2, kind: input, shape index: {}]   ;;  %s849_s3 = inlined_call_operand.vmem [shape: f32[1,384], index: 3, kind: input, shape index: {}]   ;;  %s850_s4 = inlined_call_operand.vmem [shape: f32[1,32], index: 4, kind: input, shape index: {}]   ;;  %s851_s5 = inlined_call_operand.hbm [shape: f32[2,8,32], index: 5, kind: output, shape index: {}]  }
   0x1   :  { %12 = vsyncpa [#allocation7 + $0x1], 0  ;;  %s667_s18 = smov 0   ;;  %s669_s19 = smov 0  }
   0x2   :  { %s671_s20 = smov 0   ;;  %s673_s21 = smov 0  }
   0x3 LB: > { %s688_s22 = sadd.s32 4294967295, %s633_s21   ;;  %s505_s23 = sadd.s32 4294967294, %s633_s21   ;;  %s633_s21 = sphi %s673_s21, %s857_s21   ;;  %s629_s20 = sphi %s671_s20, %s856_s20   ;;  %s625_s19 = sphi %s669_s19, %s855_s19   ;;  %s621_s18 = sphi %s667_s18, %s854_s18  }
   0x4   : > { %s692_s24 = sadd.s32 1, %s633_s21   ;;  %s135_s25 = sadd.s32 1, %s629_s20 }
   0x5   : > { %s132_s26 = ssub.s32 %s633_s21, %s692_s24  ;;  %p145_p0 = scmp.ne.s32.totalorder %s629_s20, %s625_s19 }
   0x6   : > { %p133_p1 = scmp.eq.s32.totalorder %s132_s26, 0  ;;  %p146_p2 = scmp.eq.s32.totalorder %s688_s22, 1 }
   0x7   : > { %p151_p3 = scmp.ne.s32.totalorder %s625_s19, %s621_s18  ;;  %p152_p4 = scmp.eq.s32.totalorder %s505_s23, 1 }
   0x8   : > { %s703_s27 = scalar_select %p133_p1, %s629_s20, %s135_s25  }
   0x9   : > { %p705_p5 = por %p146_p2, %p145_p0  ;;  %p709_p6 = por %p152_p4, %p151_p3 }
   0xa   : > { %p508_p7 = scmp.ge.s32.totalorder %s633_s21, 1  ;;  %p189_p8 = scmp.lt.s32.totalorder %s633_s21, 3 }
   0xc   : > { %p190_p9 = pnand %p508_p7, %p189_p8 }
   0xd   : > { %p216_p10 = scmp.lt.s32.totalorder (!%p190_p9), %s688_s22, 1  ;;  %s213_s26 = sand.u32 (!%p190_p9), 1, %s625_s19  }
   0xe   : > { %193 = sbr.rel (%p190_p9) target bundleno = 364 (0x16c), region = 40  ;;  %s509_s30 = sshll.u32 (!%p190_p9), %s213_s26, 3 }
   0xf   : > { %s516_s6 = sshll.u32 (!%p190_p9), %s688_s22, 3  ;;  %s215_s12 = scalar_lea.vmem (!%p190_p9), [#allocation6], %s509_s30 }
  0x10   : > { %s441_s9 = scalar_lea.hbm (!%p190_p9), %s851_s5, %s516_s6  ;;  %s431_s16 = scalar_lea.sflag (!%p190_p9), [#allocation7], %s213_s26 }
  0x11   : > { %s445_s14 = sshll.u32 (!%p190_p9), %s441_s9, 4  ;;  %s591_s25 = scalar_lea.hbm (!%p190_p9), %s851_s5, 16  ;;  %s446_s14 = int_to_ptr.hbm [resolvable:$true] %s445_s14 }
  0x13   : > { %v234_v0 = vld [vmem:[%s847_s1 + $0x50] sm:$0xff]  ;;  %v231_v1 = vld [vmem:[%s847_s1 + $0x38] sm:$0xff]  ;;  %v232_v3 = vld [vmem:[%s847_s1 + $0x40] sm:$0xff]  ;;  %v635_v4 = vmov -inf   ;;  %s217_s15 = scalar_select %p216_p10, %s688_s22, 1  ;;  %vm244_vm0 = vcmask 261120  }
  0x14   : > { %280 = vmatpush.msra.mxu1 %v234_v0  ;;  %v235_v2 = vld [vmem:[%s847_s1 + $0x58] sm:$0xff]  ;;  %220 = vst [vmem:[#allocation3] sm:$0x1] %v635_v4  ;;  %v228_v5 = vld [vmem:[%s847_s1 + $0x20] sm:$0xff]  ;;  %v233_v6 = vld [vmem:[%s847_s1 + $0x48] sm:$0xff]  ;;  %v636_v14 = vmov 0.0  }
  0x15   : > { %300 = vmatpush.msra.mxu2 %v235_v2  ;;  %v229_v7 = vld [vmem:[%s847_s1 + $0x28] sm:$0xff]  ;;  %260 = vmatpush.msra.mxu0 %v233_v6  ;;  %v230_v8 = vld [vmem:[%s847_s1 + $0x30] sm:$0xff]  ;;  %s510_s8 = sshll.u32 %s217_s15, 3  ;;  %v227_v10 = vld [vmem:[%s847_s1 + $0x18] sm:$0xff]  ;;  %221 = vst [vmem:[#allocation4] sm:$0x1] %v636_v14 }
  0x16   : > { %281 = vmatpush.msra.mxu1 %v231_v1  ;;  %v225_v9 = vld [vmem:[%s847_s1 + $0x8] sm:$0xff]  ;;  %s219_s13 = scalar_lea.vmem %s846_s0, %s510_s8  ;;  %v226_v11 = vld [vmem:[%s847_s1 + $0x10] sm:$0xff]  ;;  %v224_v13 = vld [vmem:[%s847_s1] sm:$0xff]  ;;  %222 = vst [vmem:[#allocation5] sm:$0x1] %v636_v14  ;;  %s585_s22 = sshra.s32 %s446_s14, 4  ;;  %s586_s22 = int_to_ptr.hbm [resolvable:$true] %s585_s22 }
  0x17   : > { %301 = vmatpush.msra.mxu2 %v232_v3  ;;  %261 = vmatpush.msra.mxu0 %v230_v8  ;;  %v223_v12 = vld [vmem:[%s219_s13] sm:$0xff]  ;;  %v404_v24 = vld [vmem:[%s848_s2 + $0x78] sm:$0xff]  ;;  %v403_v27 = vld [vmem:[%s848_s2 + $0x70] sm:$0xff]  ;;  %s443_s13 = sshll.u32 %s215_s12, 4  ;;  %s587_s17 = scalar_lea.hbm %s586_s22, 8  ;;  %s444_s13 = int_to_ptr.vmem [resolvable:$true] %s443_s13 }
  0x18   : > { %282 = vmatpush.msra.mxu1 %v228_v5  ;;  %v236_v15 = vld [vmem:[%s849_s3] sm:$0x7]  ;;  %409 = vmatpush.msra.mxu3 %v404_v24  ;;  %v402_v28 = vld [vmem:[%s848_s2 + $0x68] sm:$0xff]  ;;  %v400_v32 = vld [vmem:[%s848_s2 + $0x58] sm:$0xff]  ;;  %p588_p11 = scmp.ne.s32.totalorder %s586_s22, %s587_s17  ;;  %p592_p0 = scmp.lt.s32.totalorder %s586_s22, %s851_s5 }
  0x19   : > { %302 = vmatpush.msra.mxu2 %v229_v7  ;;  %262 = vmatpush.msra.mxu0 %v227_v10  ;;  %v239_v16 = vperm.slane %v236_v15, 1  ;;  %v401_v30 = vld [vmem:[%s848_s2 + $0x60] sm:$0xff]  ;;  %v238_v33 = vperm.slane %v236_v15, 0  ;;  %v399_v36 = vld [vmem:[%s848_s2 + $0x50] sm:$0xff]  ;;  %v398_v38 = vld [vmem:[%s848_s2 + $0x48] sm:$0xff]  ;;  %v240_v39 = vperm.slane %v236_v15, 2  ;;  %p593_p1 = scmp.lt.s32.totalorder %s591_s25, %s587_s17 }
  0x1a   : > { %283 = vmatpush.msra.mxu1 %v225_v9  ;;  %410 = vmatpush.msra.mxu3 %v403_v27  ;;  %v397_v43 = vld [vmem:[%s848_s2 + $0x40] sm:$0xff]  ;;  %v396_v44 = vld [vmem:[%s848_s2 + $0x38] sm:$0xff]  ;;  %v395_v48 = vld [vmem:[%s848_s2 + $0x30] sm:$0xff]  ;;  %p589_p12 = pnand %p588_p11, %p705_p5 }
  0x1b   : > { %512 = vmatmul.msk.f32.vlgmr.msra.gmra.mxu1 %vm244_vm0, %v223_v12  ;;  %303 = vmatpush.msra.mxu2 %v226_v11  ;;  %v309_v25 = vld [vmem:[#allocation3] sm:$0x1]  ;;  %v394_v50 = vld [vmem:[%s848_s2 + $0x28] sm:$0xff]  ;;  %v392_v56 = vld [vmem:[%s848_s2 + $0x18] sm:$0xff]  ;;  %p594_p2 = por %p593_p1, %p592_p0 }
  0x1c   : > { %513 = vmatmul.msk.f32.vlgmr.msra.gmra.mxu2 %vm244_vm0, %v223_v12  ;;  %263 = vmatpush.msra.mxu0 %v224_v13  ;;  %v393_v53 = vld [vmem:[%s848_s2 + $0x20] sm:$0xff]  ;;  %v391_v59 = vld [vmem:[%s848_s2 + $0x10] sm:$0xff]  ;;  %v390_v1 = vld [vmem:[%s848_s2 + $0x8] sm:$0xff]  ;;  %p590_p13 = pneg %p589_p12 }
  0x1d   : > { %511 = vmatmul.msk.f32.vlgmr.msra.gmra.mxu0 %vm244_vm0, %v223_v12  ;;  %411 = vmatpush.msra.mxu3 %v402_v28  ;;  %v326_v0 = vld [vmem:[#allocation4] sm:$0x1]  ;;  %v336_v4 = vld [vmem:[#allocation5] sm:$0x1] }
  0x1e   : > { %v389_v5 = vld [vmem:[%s848_s2] sm:$0xff]  ;;  %p595_p3 = pnand %p594_p2, %p590_p13 }
  0x1f   : > { %412 = vmatpush.msra.mxu3 %v401_v30 }
  0x21   : > { %413 = vmatpush.msra.mxu3 %v400_v32 }
  0x23   : > { %414 = vmatpush.msra.mxu3 %v399_v36 }
  0x25   : > { %415 = vmatpush.msra.mxu3 %v398_v38 }
  0x27   : > { %416 = vmatpush.msra.mxu3 %v397_v43 }
  0x29   : > { %417 = vmatpush.msra.mxu3 %v396_v44 }
  0x2b   : > { %418 = vmatpush.msra.mxu3 %v395_v48 }
  0x2d   : > { %419 = vmatpush.msra.mxu3 %v394_v50 }
  0x2f   : > { %420 = vmatpush.msra.mxu3 %v393_v53 }
  0x31   : > { %421 = vmatpush.msra.mxu3 %v392_v56 }
  0x33   : > { %422 = vmatpush.msra.mxu3 %v391_v59 }
  0x35   : > { %423 = vmatpush.msra.mxu3 %v390_v1 }
  0x37   : > { %424 = vmatpush.msra.mxu3 %v389_v5 }
  0x98   : > { %v285_v17 = vpop.f32.mrf.mxu1 }
  0x99   : > { %v286_v18 = vadd.f32 %v285_v17, %v239_v16 }
  0x9a   : > { %v265_v35 = vpop.f32.mrf.mxu0 }
  0x9b   : > { %v310_v19 = vrot.slane %v286_v18, 4  ;;  %v266_v40 = vadd.f32 %v265_v35, %v238_v33 }
  0x9d   : > { %v311_v20 = vmax.f32 %v286_v18, %v310_v19  ;;  %v514_v46 = vmul.f32 -1.442695, %v266_v40 }
  0x9f   : > { %v312_v21 = vrot.slane %v311_v20, 2  ;;  %v305_v42 = vpop.f32.mrf.mxu2 }
  0xa0   : > { %v306_v45 = vadd.f32 %v305_v42, %v240_v39  ;;  %v560_v39 = vld [vmem:[%s850_s4] ss:$0 sm:$0xff] }
  0xa1   : > { %v313_v22 = vmax.f32 %v311_v20, %v312_v21 }
  0xa3   : > { %v314_v23 = vrot.slane %v313_v22, 1 }
  0xa5   : > { %v315_v26 = vmax.f32 %v313_v22, %v314_v23 }
  0xa7   : > { %v316_v29 = vmax.f32 %v309_v25, %v315_v26 }
  0xa9   : > { %v321_v31 = vperm.slane %v316_v29, 0  ;;  %347 = vst [vmem:[#allocation3] sm:$0x1] %v316_v29  ;;  %v317_v41 = vsub.f32 %v309_v25, %v316_v29 }
  0xab   : > { %v323_v34 = vsub.f32 %v286_v18, %v321_v31  ;;  %v318_v47 = vmul.f32 1.442695, %v317_v41 }
  0xad   : > { %v324_v37 = vmul.f32 1.442695, %v323_v34 }
  0xaf   : > { %561 = vpow2.f32 %v324_v37 }
  0xb0   : > { %563 = vpow2.f32 %v514_v46 }
  0xb1   : > { %565 = vpow2.f32 %v318_v47 }
  0xb5   : > { %v562_v49 = vpop.eup %561 }
  0xb6   : > { %v328_v51 = vrot.slane %v562_v49, 4  ;;  %v338_v52 = vmul.f32 %v562_v49, %v306_v45  ;;  %v564_v60 = vpop.eup %563 }
  0xb7   : > { %v566_v63 = vpop.eup %565  ;;  %v369_v9 = vadd.f32 1.0, %v564_v60 }
  0xb8   : > { %v329_v54 = vadd.f32 %v562_v49, %v328_v51  ;;  %v339_v55 = vrot.slane %v338_v52, 4  ;;  %v327_v7 = vmul.f32 %v566_v63, %v326_v0  ;;  %v337_v11 = vmul.f32 %v566_v63, %v336_v4 }
  0xb9   : > { %567 = vrcp.f32 %v369_v9  ;;  %vm375_vm1 = vweird.f32 %v369_v9  ;;  %v381_v25 = vand.u32 2147483648, %v369_v9  ;;  %v379_v28 = vand.u32 2147483647, %v369_v9 }
  0xba   : > { %v330_v57 = vrot.slane %v329_v54, 2  ;;  %v340_v58 = vadd.f32 %v339_v55, %v338_v52 }
  0xbb   : > { %v382_v33 = vor.u32 1.1754944e-38, %v381_v25  ;;  %vm380_vm8 = vcmp.eq.f32.partialorder %v379_v28, 8.507059e+37 }
  0xbc   : > { %v331_v61 = vadd.f32 %v330_v57, %v329_v54  ;;  %v341_v62 = vrot.slane %v340_v58, 2 }
  0xbe   : > { %v332_v2 = vrot.slane %v331_v61, 1  ;;  %v342_v3 = vadd.f32 %v341_v62, %v340_v58 }
  0xbf   : > { %v568_v14 = vpop.eup %567 }
  0xc0   : > { %v333_v6 = vadd.f32 %v332_v2, %v331_v61  ;;  %v343_v8 = vrot.slane %v342_v3, 1  ;;  %v371_v16 = vmul.f32 %v568_v14, %v369_v9  ;;  %vm376_vm2 = vweird.f32 %v568_v14 }
  0xc1   : > { %vm377_vm5 = vmor %vm375_vm1, %vm376_vm2 }
  0xc2   : > { %v334_v10 = vadd.f32 %v333_v6, %v327_v7  ;;  %v344_v12 = vadd.f32 %v343_v8, %v342_v3  ;;  %v372_v17 = vsub.f32 1.0, %v371_v16 }
  0xc4   : > { %335 = vst [vmem:[#allocation4] sm:$0x1] %v334_v10  ;;  %v345_v13 = vadd.f32 %v344_v12, %v337_v11  ;;  %v373_v21 = vmul.f32 %v568_v14, %v372_v17 }
  0xc6   : > { %346 = vst [vmem:[#allocation5] sm:$0x1] %v345_v13  ;;  %v374_v27 = vadd.f32 %v568_v14, %v373_v21 }
  0xc8   : > { %v378_v35 = vsel %vm377_vm5, %v568_v14, %v374_v27 }
  0xc9   : > { %v383_v37 = vsel %vm380_vm8, %v382_v33, %v378_v35 }
  0xcb   : > { %v349_v15 = vld [vmem:[#allocation4] sm:$0x1] }
  0xcc   : > { %569 = vrcp.f32 %v349_v15  ;;  %v361_v22 = vand.u32 2147483648, %v349_v15  ;;  %v359_v24 = vand.u32 2147483647, %v349_v15  ;;  %vm355_vm4 = vweird.f32 %v349_v15 }
  0xcd   : > { %v348_v31 = vld [vmem:[#allocation5] sm:$0x1] }
  0xce   : > { %v362_v29 = vor.u32 1.1754944e-38, %v361_v22  ;;  %vm360_vm7 = vcmp.eq.f32.partialorder %v359_v24, 8.507059e+37 }
  0xd2   : > { %v570_v18 = vpop.eup %569 }
  0xd3   : > { %v351_v19 = vmul.f32 %v570_v18, %v349_v15  ;;  %vm356_vm3 = vweird.f32 %v570_v18 }
  0xd4   : > { %vm357_vm6 = vmor %vm355_vm4, %vm356_vm3 }
  0xd5   : > { %v352_v20 = vsub.f32 1.0, %v351_v19 }
  0xd7   : > { %v353_v23 = vmul.f32 %v570_v18, %v352_v20 }
  0xd9   : > { %v354_v26 = vadd.f32 %v570_v18, %v353_v23 }
  0xdb   : > { %v358_v30 = vsel %vm357_vm6, %v570_v18, %v354_v26 }
  0xdc   : > { %v363_v32 = vsel %vm360_vm7, %v362_v29, %v358_v30 }
  0xdd   : > { %v364_v34 = vmul.f32 %v363_v32, %v348_v31 }
  0xdf   : > { %v386_v36 = vperm.slane %v364_v34, 0 }
  0xe1   : > { %v388_v38 = vmul.f32 %v386_v36, %v383_v37 }
  0xe3   : > { %425 = vmatmul.f32.vlgmr.msra.gmra.mxu3 %v388_v38 }
 0x166   : > { %v426_v40 = vpop.f32.mrf.mxu3 }
 0x167   : > { %v427_v41 = vadd.f32 %v560_v39, %v426_v40 }
 0x169   : > { %429 = vst.msk [vmem:[%s215_s12] sm:$0xff] %vm244_vm0, %v427_v41 }
 0x16a   : > { %598 = shalt.err (!%p595_p3)
}
 0x16b   : > { %519 = dma.vmem_to_hbm [thread:$0]  (%p705_p5), %s444_s13, 128, %s446_s14, %s431_s16  }
 0x16c PF: > { %p525_p4 = scmp.ge.s32.totalorder %s633_s21, 2  ;;  %s457_s26 = sand.u32 1, %s621_s18  }
 0x16d   : > { %s458_s7 = scalar_lea.sflag [#allocation7], %s457_s26 }
 0x16e   : > { %p522_p7 = pnand %p525_p4, %p709_p6 }
 0x170   : > { %p523_p8 = pneg %p522_p7 }
 0x172   : > { %616 = dma.done.wait (%p523_p8), %s458_s7, 128  }
 0x173   : > { %618 = vsyncadd (%p523_p8), %s458_s7, 4294967168  ;;  %p15_p9 = scmp.ge.s32.totalorder %s692_s24, 4   ;;  %s854_s18 = smov %s625_s19 }
 0x174   : > { %s855_s19 = smov %s629_s20  ;;  %s856_s20 = smov %s703_s27 }
 0x175   : > { %s857_s21 = smov %s692_s24  ;;  %17 = sbr.rel (!%p15_p9) target bundleno = 3 (0x3), region = 75 }
 0x17a   :  { %464 = vsyncpa [#allocation7], 1 }
 0x17b   :  { %466 = vsyncpa [#allocation7 + $0x1], 1 }

</bundles_post_ra>
